<compile_context>
chip_gen: v7x
topology: tpu7x:2x2x1
jax: 0.10.0
libtpu: 0.0.40
codegen_flags: <defaults>
</compile_context>

<pallas_src>
import jax
import jax.numpy as jnp
from jax.experimental import pallas as pl
from jax.experimental.pallas import tpu as pltpu

BN_EPS = 1e-5
LANE = 128
SUBLANE = 8


def _round_up(n, m):
    return ((n + m - 1) // m) * m


# --------------------------------------------------------------------------
# Stage 1 kernel: h_pre = x @ W   (+ batch-wide per-feature sum / sum-of-sq)
# (bias omitted on purpose: training-mode BN cancels it exactly)
# --------------------------------------------------------------------------
def _linear_stats_kernel(x_ref, w_ref, h_ref, stats_ref):
    @pl.when(pl.program_id(0) == 0)
    def _():
        stats_ref[...] = jnp.zeros_like(stats_ref)

    h = jnp.dot(x_ref[...], w_ref[...], preferred_element_type=jnp.float32)
    h_ref[...] = h
    stats_ref[0:1, :] += jnp.sum(h, axis=0, keepdims=True)
    stats_ref[1:2, :] += jnp.sum(h * h, axis=0, keepdims=True)


# --------------------------------------------------------------------------
# Stage 2 kernel: a = relu(h_pre * scale + shift); o_pre = a @ W  (+ stats)
# --------------------------------------------------------------------------
def _make_bn_linear_stats_kernel(tb, b_true, needs_mask):
    def kernel(h_ref, ss_ref, w_ref, o_ref, stats_ref):
        @pl.when(pl.program_id(0) == 0)
        def _():
            stats_ref[...] = jnp.zeros_like(stats_ref)

        ss = ss_ref[...]
        a = jnp.maximum(h_ref[...] * ss[0:1, :] + ss[1:2, :], 0.0)
        if needs_mask:
            # Zero out batch-padding rows so they cannot pollute the stats.
            rows = (jax.lax.broadcasted_iota(jnp.int32, a.shape, 0)
                    + pl.program_id(0) * tb)
            a = jnp.where(rows < b_true, a, 0.0)
        o = jnp.dot(a, w_ref[...], preferred_element_type=jnp.float32)
        o_ref[...] = o
        stats_ref[0:1, :] += jnp.sum(o, axis=0, keepdims=True)
        stats_ref[1:2, :] += jnp.sum(o * o, axis=0, keepdims=True)

    return kernel


# --------------------------------------------------------------------------
# Stage 3 kernel: a = relu(h_pre * scale + shift); out = a @ [Wmu|Wls] + b
# --------------------------------------------------------------------------
def _bn_head_kernel(h_ref, ss_ref, w_ref, b_ref, o_ref):
    ss = ss_ref[...]
    a = jnp.maximum(h_ref[...] * ss[0:1, :] + ss[1:2, :], 0.0)
    o_ref[...] = (
        jnp.dot(a, w_ref[...], preferred_element_type=jnp.float32) + b_ref[...]
    )


# --------------------------------------------------------------------------
# Tiny XLA epilogue: fold batch stats + gamma/beta into fused scale/shift.
# --------------------------------------------------------------------------
def _fused_scale_shift(stats, gamma, beta, n):
    mean = stats[0:1, :] / n
    var = jnp.maximum(stats[1:2, :] / n - mean * mean, 0.0)  # clamp for stability
    scale = gamma * jax.lax.rsqrt(var + BN_EPS)
    shift = beta - mean * scale
    return jnp.concatenate([scale, shift], axis=0)  # (2, H_pad)


# --------------------------------------------------------------------------
# Wrapper
# --------------------------------------------------------------------------
def encoder_forward(x, packed):
    """x: [B, d_in] float32. packed: output of pack_params()."""
    d_in, h1, h2, nl = packed["dims"]
    B = x.shape[0]
    d_in_p, h1_p = packed["w1"].shape
    h2_p = packed["w2"].shape[1]
    nout_p = packed["w_head"].shape[1]

    tb = 512 if B >= 512 else _round_up(B, SUBLANE)
    b_pad = _round_up(B, tb)
    nb = b_pad // tb
    needs_mask = b_pad != B

    xp = jnp.pad(x.astype(jnp.float32), ((0, b_pad - B), (0, d_in_p - d_in)))

    # ---- stage 1: h1_pre = x @ W1 ; accumulate full-batch stats of h1_pre ----
    h1pre, st1 = pl.pallas_call(
        _linear_stats_kernel,
        grid=(nb,),
        in_specs=[
            pl.BlockSpec((tb, d_in_p), lambda i: (i, 0)),
            pl.BlockSpec((d_in_p, h1_p), lambda i: (0, 0)),
        ],
        out_specs=(
            pl.BlockSpec((tb, h1_p), lambda i: (i, 0)),
            pl.BlockSpec((SUBLANE, h1_p), lambda i: (0, 0)),
        ),
        out_shape=(
            jax.ShapeDtypeStruct((b_pad, h1_p), jnp.float32),
            jax.ShapeDtypeStruct((SUBLANE, h1_p), jnp.float32),
        ),
        compiler_params=pltpu.CompilerParams(dimension_semantics=("arbitrary",)),
    )(xp, packed["w1"])

    ss1 = _fused_scale_shift(st1, packed["g1"], packed["be1"], B)

    # ---- stage 2: apply BN1+ReLU, h2_pre = h1 @ W2 ; full-batch stats ----
    h2pre, st2 = pl.pallas_call(
        _make_bn_linear_stats_kernel(tb, B, needs_mask),
        grid=(nb,),
        in_specs=[
            pl.BlockSpec((tb, h1_p), lambda i: (i, 0)),
            pl.BlockSpec((2, h1_p), lambda i: (0, 0)),
            pl.BlockSpec((h1_p, h2_p), lambda i: (0, 0)),
        ],
        out_specs=(
            pl.BlockSpec((tb, h2_p), lambda i: (i, 0)),
            pl.BlockSpec((SUBLANE, h2_p), lambda i: (0, 0)),
        ),
        out_shape=(
            jax.ShapeDtypeStruct((b_pad, h2_p), jnp.float32),
            jax.ShapeDtypeStruct((SUBLANE, h2_p), jnp.float32),
        ),
        compiler_params=pltpu.CompilerParams(dimension_semantics=("arbitrary",)),
    )(h1pre, ss1, packed["w2"])

    ss2 = _fused_scale_shift(st2, packed["g2"], packed["be2"], B)

    # ---- stage 3: apply BN2+ReLU, fused heads (lane-dense 128-wide output) ----
    out = pl.pallas_call(
        _bn_head_kernel,
        grid=(nb,),
        in_specs=[
            pl.BlockSpec((tb, h2_p), lambda i: (i, 0)),
            pl.BlockSpec((2, h2_p), lambda i: (0, 0)),
            pl.BlockSpec((h2_p, nout_p), lambda i: (0, 0)),
            pl.BlockSpec((1, nout_p), lambda i: (0, 0)),
        ],
        out_specs=pl.BlockSpec((tb, nout_p), lambda i: (i, 0)),
        out_shape=jax.ShapeDtypeStruct((b_pad, nout_p), jnp.float32),
        compiler_params=pltpu.CompilerParams(dimension_semantics=("parallel",)),
    )(h2pre, ss2, packed["w_head"], packed["b_head"])

    mu = out[:B, 0:nl]
    logsigma = out[:B, nl:2 * nl]
    return mu, logsigma


# --------------------------------------------------------------------------
# Parameter init (natural PyTorch-like shapes) and lane-padded packing
# --------------------------------------------------------------------------
def init_params(key, arch, n_latent):
    """Deterministic parameter init. Linear weights stored as (in, out)."""
    ks = jax.random.split(key, 4)
    d_in, d_h1, d_h2 = arch

    def lin(k, fan_in, fan_out):
        bound = 1.0 / jnp.sqrt(fan_in)
        kw, kb = jax.random.split(k)
        w = jax.random.uniform(kw, (fan_in, fan_out), jnp.float32, -bound, bound)
        b = jax.random.uniform(kb, (1, fan_out), jnp.float32, -bound, bound)
        return w, b

    w1, b1 = lin(ks[0], d_in, d_h1)
    w2, b2 = lin(ks[1], d_h1, d_h2)
    wmu, bmu = lin(ks[2], d_h2, n_latent)
    wls, bls = lin(ks[3], d_h2, n_latent)

    return {
        "w1": w1, "b1": b1,
        "g1": jnp.ones((1, d_h1), jnp.float32),
        "be1": jnp.zeros((1, d_h1), jnp.float32),
        "w2": w2, "b2": b2,
        "g2": jnp.ones((1, d_h2), jnp.float32),
        "be2": jnp.zeros((1, d_h2), jnp.float32),
        "wmu": wmu, "bmu": bmu,
        "wls": wls, "bls": bls,
    }


def pack_params(params):
    """Pad feature dims to 128 lanes, fuse the two head weights/biases.
    b1/b2 are intentionally dropped (BatchNorm in training mode cancels them)."""
    d_in, h1 = params["w1"].shape
    h2 = params["w2"].shape[1]
    nl = params["wmu"].shape[1]
    d_in_p = _round_up(d_in, LANE)
    h1_p = _round_up(h1, LANE)
    h2_p = _round_up(h2, LANE)
    nout_p = _round_up(2 * nl, LANE)

    def pad2(a, r, c):
        return jnp.pad(a, ((0, r - a.shape[0]), (0, c - a.shape[1])))

    return {
        "w1": pad2(params["w1"], d_in_p, h1_p),
        "w2": pad2(params["w2"], h1_p, h2_p),
        "w_head": pad2(jnp.concatenate([params["wmu"], params["wls"]], axis=1),
                       h2_p, nout_p),
        "b_head": pad2(jnp.concatenate([params["bmu"], params["bls"]], axis=1),
                       1, nout_p),
        "g1": pad2(params["g1"], 1, h1_p),
        "be1": pad2(params["be1"], 1, h1_p),
        "g2": pad2(params["g2"], 1, h2_p),
        "be2": pad2(params["be2"], 1, h2_p),
        "dims": (d_in, h1, h2, nl),
    }


# --------------------------------------------------------------------------
# Pure-JAX reference (exact PyTorch semantics, including the linear biases)
# --------------------------------------------------------------------------
def _reference(x, p):
    def bn_relu(h, g, be):
        m = jnp.mean(h, axis=0, keepdims=True)
        v = jnp.mean((h - m) ** 2, axis=0, keepdims=True)
        return jnp.maximum((h - m) / jnp.sqrt(v + BN_EPS) * g + be, 0.0)

    h = bn_relu(x @ p["w1"] + p["b1"], p["g1"], p["be1"])
    h = bn_relu(h @ p["w2"] + p["b2"], p["g2"], p["be2"])
    return h @ p["wmu"] + p["bmu"], h @ p["wls"] + p["bls"]


if __name__ == "__main__":
    # Small shapes consistent with the module: arch=[32, 64, 64], n_latent=2.
    arch = [32, 64, 64]
    n_latent = 2

    key = jax.random.PRNGKey(0)
    k_x1, k_x2, k_p = jax.random.split(key, 3)
    params = init_params(k_p, arch, n_latent)
    packed = pack_params(params)

    # batch=8 exercises the fully-aligned path; batch=13 exercises batch
    # padding + the row-masked stats path.
    for batch, kx in ((8, k_x1), (13, k_x2)):
        x = jax.random.normal(kx, (batch, arch[0]), jnp.float32)
        mu, logsigma = encoder_forward(x, packed)
        jax.block_until_ready((mu, logsigma))

        mu_ref, ls_ref = _reference(x, params)
        assert mu.shape == (batch, n_latent)
        assert logsigma.shape == (batch, n_latent)
        assert jnp.allclose(mu, mu_ref, atol=2e-4, rtol=2e-4), (
            float(jnp.max(jnp.abs(mu - mu_ref))))
        assert jnp.allclose(logsigma, ls_ref, atol=2e-4, rtol=2e-4), (
            float(jnp.max(jnp.abs(logsigma - ls_ref))))

    print("KERNEL_OK")
</pallas_src>

<mosaic_0001>
module attributes {stable_mosaic.version = 11 : i64} {
  func.func @_linear_stats_kernel(%arg0: i32, %arg1: memref<8x128xf32, #tpu.memory_space<vmem>>, %arg2: memref<128x128xf32, #tpu.memory_space<vmem>>, %arg3: memref<8x128xf32, #tpu.memory_space<vmem>>, %arg4: memref<8x128xf32, #tpu.memory_space<vmem>>) attributes {dimension_semantics = [#tpu.dimension_semantics<arbitrary>], iteration_bounds = array<i64: 1>, scalar_prefetch = 0 : i64, scratch_operands = 0 : i64, tpu.core_type = #tpu.core_type<tc>, window_params = [{transform_indices = @transform_0, window_bounds = array<i64: 8, 128>}, {pipeline_mode = #tpu.pipeline_mode<synchronous>, transform_indices = @transform_1, window_bounds = array<i64: 128, 128>}, {transform_indices = @transform_2, window_bounds = array<i64: 8, 128>}, {pipeline_mode = #tpu.pipeline_mode<synchronous>, transform_indices = @transform_3, window_bounds = array<i64: 8, 128>}]} {
    %c0_i32 = arith.constant 0 : i32
    %0 = arith.cmpi eq, %arg0, %c0_i32 : i32
    %1 = arith.extui %0 : i1 to i32
    %c0_i32_0 = arith.constant 0 : i32
    %2 = arith.cmpi ne, %1, %c0_i32_0 : i32
    scf.if %2 {
      %cst_15 = arith.constant 0.000000e+00 : f32
      %18 = vector.broadcast %cst_15 : f32 to vector<8x128xf32>
      %c0_16 = arith.constant 0 : index
      %c0_17 = arith.constant 0 : index
      %19 = vector.load %arg4[%c0_16, %c0_17] : memref<8x128xf32, #tpu.memory_space<vmem>>, vector<8x128xf32>
      tpu.vector_store %arg4[%c0_16, %c0_17], %18 {strides = array<i32>} : memref<8x128xf32, #tpu.memory_space<vmem>>, vector<8x128xf32>,
    } else {
    }
    %c0 = arith.constant 0 : index
    %c0_1 = arith.constant 0 : index
    %3 = vector.load %arg1[%c0, %c0_1] : memref<8x128xf32, #tpu.memory_space<vmem>>, vector<8x128xf32>
    %c0_2 = arith.constant 0 : index
    %c0_3 = arith.constant 0 : index
    %4 = vector.load %arg2[%c0_2, %c0_3] : memref<128x128xf32, #tpu.memory_space<vmem>>, vector<128x128xf32>
    %cst = arith.constant dense<0.000000e+00> : vector<8x128xf32>
    %5 = tpu.matmul %3, %4, %cst {dimension_numbers = #tpu.dot_dimension_numbers<[1], [0], [0], [1], [0, 0, 1, 1], [], []>} : vector<8x128xf32>, vector<128x128xf32>, vector<8x128xf32> -> vector<8x128xf32>
    %c0_4 = arith.constant 0 : index
    %c0_5 = arith.constant 0 : index
    %6 = vector.load %arg3[%c0_4, %c0_5] : memref<8x128xf32, #tpu.memory_space<vmem>>, vector<8x128xf32>
    tpu.vector_store %arg3[%c0_4, %c0_5], %5 {strides = array<i32>} : memref<8x128xf32, #tpu.memory_space<vmem>>, vector<8x128xf32>,
    %c0_6 = arith.constant 0 : index
    %c0_7 = arith.constant 0 : index
    %7 = vector.load %arg4[%c0_6, %c0_7] : memref<8x128xf32, #tpu.memory_space<vmem>>, vector<1x128xf32>
    %cst_8 = arith.constant dense<0.000000e+00> : vector<128xf32>
    %8 = vector.multi_reduction <add>, %5, %cst_8 [0] : vector<8x128xf32> to vector<128xf32>
    %9 = vector.shape_cast %8 : vector<128xf32> to vector<1x128xf32>
    %10 = arith.addf %7, %9 : vector<1x128xf32>
    %c0_9 = arith.constant 0 : index
    %c0_10 = arith.constant 0 : index
    %11 = vector.load %arg4[%c0_9, %c0_10] : memref<8x128xf32, #tpu.memory_space<vmem>>, vector<1x128xf32>
    tpu.vector_store %arg4[%c0_9, %c0_10], %10 {strides = array<i32>} : memref<8x128xf32, #tpu.memory_space<vmem>>, vector<1x128xf32>,
    %c1 = arith.constant 1 : index
    %c0_11 = arith.constant 0 : index
    %12 = vector.load %arg4[%c1, %c0_11] : memref<8x128xf32, #tpu.memory_space<vmem>>, vector<1x128xf32>
    %13 = arith.mulf %5, %5 : vector<8x128xf32>
    %cst_12 = arith.constant dense<0.000000e+00> : vector<128xf32>
    %14 = vector.multi_reduction <add>, %13, %cst_12 [0] : vector<8x128xf32> to vector<128xf32>
    %15 = vector.shape_cast %14 : vector<128xf32> to vector<1x128xf32>
    %16 = arith.addf %12, %15 : vector<1x128xf32>
    %c1_13 = arith.constant 1 : index
    %c0_14 = arith.constant 0 : index
    %17 = vector.load %arg4[%c1_13, %c0_14] : memref<8x128xf32, #tpu.memory_space<vmem>>, vector<1x128xf32>
    tpu.vector_store %arg4[%c1_13, %c0_14], %16 {strides = array<i32>} : memref<8x128xf32, #tpu.memory_space<vmem>>, vector<1x128xf32>,
    return
  }
  func.func @transform_0(%arg0: i32) -> (i32, i32) {
    %c0_i32 = arith.constant 0 : i32
    %c0_i32_0 = arith.constant 0 : i32
    return %arg0, %c0_i32 : i32, i32
  }
  func.func @transform_1(%arg0: i32) -> (i32, i32) {
    %c0_i32 = arith.constant 0 : i32
    %c0_i32_0 = arith.constant 0 : i32
    %c0_i32_1 = arith.constant 0 : i32
    return %c0_i32, %c0_i32_0 : i32, i32
  }
  func.func @transform_2(%arg0: i32) -> (i32, i32) {
    %c0_i32 = arith.constant 0 : i32
    %c0_i32_0 = arith.constant 0 : i32
    return %arg0, %c0_i32 : i32, i32
  }
  func.func @transform_3(%arg0: i32) -> (i32, i32) {
    %c0_i32 = arith.constant 0 : i32
    %c0_i32_0 = arith.constant 0 : i32
    %c0_i32_1 = arith.constant 0 : i32
    return %c0_i32, %c0_i32_0 : i32, i32
  }
}

</mosaic_0001>

<bundles_post_ra>
// kernel: tpu_custom_call.1
= control target key start
LH: loop header
LB: loop body
LE: loop exit
PB: predicated region body
PF: predicated region fallthrough
CT: control target
= control target key end

     0   :  { %9 = vsyncpa [#allocation3], 0  ;;  %s448_s0 = inlined_call_operand.hbm [shape: f32[8,128], index: 0, kind: input, shape index: {}]   ;;  %s449_s1 = inlined_call_operand.hbm [shape: f32[128,128], index: 1, kind: input, shape index: {}]   ;;  %s450_s2 = inlined_call_operand.hbm [shape: f32[8,128], index: 2, kind: output, shape index: {0}]   ;;  %s451_s3 = inlined_call_operand.hbm [shape: f32[8,128], index: 3, kind: output, shape index: {1}]  }
   0x1   :  { %10 = vsyncpa [#allocation6], 0 }
   0x2   :  { %11 = vsyncpa [#allocation4], 0 }
   0x3   :  { %12 = vsyncpa [#allocation9], 0  ;;  %s364_s12 = smov [#allocation2]   ;;  %s365_s14 = smov [#allocation5]  }
   0x4   :  { %s19_s13 = sshll.u32 %s364_s12, 4  ;;  %s28_s15 = sshll.u32 %s365_s14, 4  ;;  %s20_s13 = int_to_ptr.vmem [resolvable:$true] %s19_s13  ;;  %s393_s15 = int_to_ptr.vmem [resolvable:$true] %s28_s15 }
   0x5   :  { %s268_s18 = scalar_lea.hbm %s448_s0, 128 }
   0x6   :  { %p269_p0 = scmp.ne.s32.totalorder %s448_s0, %s268_s18  ;;  %p272_p1 = scmp.lt.u32.totalorder %s268_s18, %s448_s0 }
   0x8   :  { %p274_p2 = pnand %p272_p1, %p269_p0 }
   0xa   :  { %277 = shalt.err (!%p274_p2)
}
   0xb   :  { %s278_s23 = scalar_lea.vmem %s20_s13, 128  ;;  %p283_p4 = scmp.lt.s32.totalorder %s20_s13, %s20_s13 }
   0xc   :  { %p279_p3 = scmp.ne.s32.totalorder %s20_s13, %s278_s23  ;;  %p284_p5 = scmp.lt.s32.totalorder %s278_s23, %s278_s23 }
   0xe   :  { %p285_p6 = por %p284_p5, %p283_p4 }
  0x10   :  { %p286_p7 = pnand %p285_p6, %p279_p3 }
  0x12   :  { %289 = shalt.err (!%p286_p7)
}
  0x13   :  { %22 = dma.hbm_to_vmem [thread:$0]  %s448_s0, 128, %s20_s13, [#allocation3]  }
  0x14   :  { %s290_s28 = scalar_lea.hbm %s449_s1, 2048 }
  0x15   :  { %p291_p8 = scmp.ne.s32.totalorder %s449_s1, %s290_s28  ;;  %p294_p9 = scmp.lt.u32.totalorder %s290_s28, %s449_s1 }
  0x17   :  { %p296_p10 = pnand %p294_p9, %p291_p8 }
  0x19   :  { %299 = shalt.err (!%p296_p10)
}
  0x1a   :  { %s300_s6 = scalar_lea.vmem %s393_s15, 2048  ;;  %p305_p12 = scmp.lt.s32.totalorder %s393_s15, %s393_s15 }
  0x1b   :  { %p301_p11 = scmp.ne.s32.totalorder %s393_s15, %s300_s6  ;;  %p306_p13 = scmp.lt.s32.totalorder %s300_s6, %s300_s6 }
  0x1d   :  { %p307_p0 = por %p306_p13, %p305_p12 }
  0x1f   :  { %p308_p1 = pnand %p307_p0, %p301_p11 }
  0x21   :  { %311 = shalt.err (!%p308_p1)
}
  0x22   :  { %s366_s0 = smov 128   ;;  %s367_s7 = smov 8  }
  0x23   :  { %34 = dma.hbm_to_vmem [thread:$0]  %s449_s1, 2048, %s393_s15, [#allocation6], %s366_s0, %s366_s0, %s367_s7  }
  0x24   :  { %356 = dma.done.wait [#allocation3], 128  }
  0x25   :  { %357 = vsyncadd [#allocation3], 4294967168 }
  0x26   :  { %358 = dma.done.wait [#allocation6], 2048  }
  0x27   :  { %359 = vsyncadd [#allocation6], 4294965248  ;;  %v368_v0 = vmov 0.0|0.0   ;;  %v369_v1 = vmov 0.0   ;;  %vm370_vm0 = vmmov 0   ;;  %v47_v2 = vld [vmem:[#allocation5] sm:$0xff] }
  0x28   :  { %235 = vmatprep.subr.bf16.mxu0 %v368_v0  ;;  %45 = vst [vmem:[#allocation8] sm:$0xff] %v369_v1  ;;  %232 = vmatprep.mubr.msk.f32.mxu0 %vm370_vm0, %v369_v1  ;;  %v48_v3 = vld [vmem:[#allocation5 + $0x8] sm:$0xff]  ;;  %v49_v4 = vld [vmem:[#allocation5 + $0x10] sm:$0xff]  ;;  %v50_v6 = vld [vmem:[#allocation5 + $0x18] sm:$0xff]  ;;  %s371_s1 = smov [#allocation7]  }
  0x29   :  { %v236_v5 = vpack.c.bf16 %v48_v3, %v47_v2  ;;  %v239_v7 = vpack.c.bf16 %v50_v6, %v49_v4  ;;  %v51_v8 = vld [vmem:[#allocation5 + $0x20] sm:$0xff]  ;;  %v52_v9 = vld [vmem:[#allocation5 + $0x28] sm:$0xff]  ;;  %v53_v11 = vld [vmem:[#allocation5 + $0x30] sm:$0xff]  ;;  %s159_s10 = sshll.u32 %s371_s1, 4  ;;  %s160_s10 = int_to_ptr.vmem [resolvable:$true] %s159_s10 }
  0x2a   :  { %v242_v10 = vpack.c.bf16 %v52_v9, %v51_v8  ;;  %v54_v12 = vld [vmem:[#allocation5 + $0x38] sm:$0xff]  ;;  %v55_v14 = vld [vmem:[#allocation5 + $0x40] sm:$0xff]  ;;  %v56_v15 = vld [vmem:[#allocation5 + $0x48] sm:$0xff]  ;;  %s312_s11 = scalar_lea.vmem %s160_s10, 128  ;;  %p317_p3 = scmp.lt.s32.totalorder %s160_s10, %s160_s10 }
  0x2b   :  { %237 = vmatpush3.bf16.msra.mxu0 %v236_v5  ;;  %v245_v13 = vpack.c.bf16 %v54_v12, %v53_v11  ;;  %v248_v16 = vpack.c.bf16 %v56_v15, %v55_v14  ;;  %v57_v17 = vld [vmem:[#allocation5 + $0x50] sm:$0xff]  ;;  %v58_v18 = vld [vmem:[#allocation5 + $0x58] sm:$0xff]  ;;  %v59_v20 = vld [vmem:[#allocation5 + $0x60] sm:$0xff]  ;;  %p313_p2 = scmp.ne.s32.totalorder %s160_s10, %s312_s11  ;;  %p318_p4 = scmp.lt.s32.totalorder %s312_s11, %s312_s11 }
  0x2c   :  { %238 = vmatprep.subr.bf16.mxu0 %v368_v0  ;;  %v251_v19 = vpack.c.bf16 %v58_v18, %v57_v17  ;;  %v60_v21 = vld [vmem:[#allocation5 + $0x68] sm:$0xff]  ;;  %v61_v23 = vld [vmem:[#allocation5 + $0x70] sm:$0xff]  ;;  %v62_v24 = vld [vmem:[#allocation5 + $0x78] sm:$0xff] }
  0x2d   :  { %v254_v22 = vpack.c.bf16 %v60_v21, %v59_v20  ;;  %v257_v25 = vpack.c.bf16 %v62_v24, %v61_v23  ;;  %v46_v26 = vld [vmem:[#allocation2] sm:$0xff]  ;;  %p319_p5 = por %p318_p4, %p317_p3 }
  0x2f   :  { %240 = vmatpush3.bf16.msra.mxu0 %v239_v7  ;;  %p320_p6 = pnand %p319_p5, %p313_p2 }
  0x30   :  { %241 = vmatprep.subr.bf16.mxu0 %v368_v0 }
  0x33   :  { %243 = vmatpush3.bf16.msra.mxu0 %v242_v10 }
  0x34   :  { %244 = vmatprep.subr.bf16.mxu0 %v368_v0 }
  0x37   :  { %246 = vmatpush3.bf16.msra.mxu0 %v245_v13 }
  0x38   :  { %247 = vmatprep.subr.bf16.mxu0 %v368_v0 }
  0x3b   :  { %249 = vmatpush3.bf16.msra.mxu0 %v248_v16 }
  0x3c   :  { %250 = vmatprep.subr.bf16.mxu0 %v368_v0 }
  0x3f   :  { %252 = vmatpush3.bf16.msra.mxu0 %v251_v19 }
  0x40   :  { %253 = vmatprep.subr.bf16.mxu0 %v368_v0 }
  0x43   :  { %255 = vmatpush3.bf16.msra.mxu0 %v254_v22 }
  0x44   :  { %256 = vmatprep.subr.bf16.mxu0 %v368_v0 }
  0x47   :  { %258 = vmatpush3.bf16.msra.mxu0 %v257_v25 }
  0x4a   :  { %233 = vmatmul.mubr.f32.vlgmr.msra.gmra.mrb[0].mxu0 %v46_v26 }
 0x11d   :  { %v129_v27 = vpop.f32.mrb[0].mxu0 }
 0x11e   :  { %v135_v28 = vrot.slane %v129_v27, 4  ;;  %v144_v29 = vmul.f32 %v129_v27, %v129_v27  ;;  %133 = vst [vmem:[#allocation7] sm:$0xff] %v129_v27  ;;  %v234_v30 = vpop.f32.mrb[1].mxu0 }
 0x11f   :  { %323 = shalt.err (!%p320_p6)
}
 0x120   :  { %s324_s14 = scalar_lea.hbm %s450_s2, 128 }
 0x121   :  { %p325_p7 = scmp.ne.s32.totalorder %s450_s2, %s324_s14  ;;  %p328_p8 = scmp.lt.u32.totalorder %s324_s14, %s450_s2 }
 0x123   :  { %p330_p9 = pnand %p328_p8, %p325_p7 }
 0x125   :  { %333 = shalt.err (!%p330_p9)
}
 0x126   :  { %162 = dma.vmem_to_hbm [thread:$0]  %s160_s10, 128, %s450_s2, [#allocation4]   ;;  %v136_v31 = vadd.f32 %v135_v28, %v129_v27  ;;  %v145_v32 = vrot.slane %v144_v29, 4  ;;  %v134_v39 = vld [vmem:[#allocation8] sm:$0x1] }
 0x127   :  { %v143_v42 = vld [vmem:[#allocation8 + $0x1] sm:$0x1]  ;;  %s372_s21 = smov [#allocation8]  }
 0x128   :  { %v137_v33 = vrot.slane %v136_v31, 2  ;;  %v146_v34 = vadd.f32 %v145_v32, %v144_v29  ;;  %s169_s22 = sshll.u32 %s372_s21, 4  ;;  %s170_s22 = int_to_ptr.vmem [resolvable:$true] %s169_s22 }
 0x129   :  { %s334_s2 = scalar_lea.vmem %s170_s22, 128  ;;  %p339_p11 = scmp.lt.s32.totalorder %s170_s22, %s170_s22 }
 0x12a   :  { %v138_v35 = vadd.f32 %v137_v33, %v136_v31  ;;  %v147_v36 = vrot.slane %v146_v34, 2  ;;  %p335_p10 = scmp.ne.s32.totalorder %s170_s22, %s334_s2  ;;  %p340_p12 = scmp.lt.s32.totalorder %s334_s2, %s334_s2 }
 0x12c   :  { %v139_v37 = vrot.slane %v138_v35, 1  ;;  %v148_v38 = vadd.f32 %v147_v36, %v146_v34  ;;  %p341_p13 = por %p340_p12, %p339_p11 }
 0x12e   :  { %v140_v40 = vadd.f32 %v139_v37, %v138_v35  ;;  %v149_v41 = vrot.slane %v148_v38, 1  ;;  %p342_p0 = pnand %p341_p13, %p335_p10 }
 0x130   :  { %v150_v43 = vadd.f32 %v149_v41, %v148_v38  ;;  %v141_v44 = vadd.f32 %v140_v40, %v134_v39 }
 0x132   :  { %142 = vst [vmem:[#allocation8] sm:$0x1] %v141_v44  ;;  %v151_v45 = vadd.f32 %v150_v43, %v143_v42 }
 0x134   :  { %152 = vst [vmem:[#allocation8 + $0x1] sm:$0x1] %v151_v45 }
 0x135   :  { %345 = shalt.err (!%p342_p0)
}
 0x136   :  { %s346_s25 = scalar_lea.hbm %s451_s3, 128 }
 0x137   :  { %p347_p1 = scmp.ne.s32.totalorder %s451_s3, %s346_s25  ;;  %p350_p2 = scmp.lt.u32.totalorder %s346_s25, %s451_s3 }
 0x139   :  { %p352_p3 = pnand %p350_p2, %p347_p1 }
 0x13b   :  { %355 = shalt.err (!%p352_p3)
}
 0x13c   :  { %172 = dma.vmem_to_hbm [thread:$0]  %s170_s22, 128, %s451_s3, [#allocation9]  }
 0x13d   :  { %360 = dma.done.wait [#allocation4], 128  }
 0x13e   :  { %361 = vsyncadd [#allocation4], 4294967168 }
 0x13f   :  { %362 = dma.done.wait [#allocation9], 128  }
 0x140   :  { %363 = vsyncadd [#allocation9], 4294967168 }
 0x141   :  { %179 = vsyncpa [#allocation3], 1 }
 0x142   :  { %180 = vsyncpa [#allocation6], 1 }
 0x143   :  { %181 = vsyncpa [#allocation4], 1 }
 0x144   :  { %182 = vsyncpa [#allocation9], 1 }

</bundles_post_ra>
